<compile_context>
chip_gen: v7x
topology: tpu7x:2x2x1
jax: 0.10.0
libtpu: 0.0.40
codegen_flags: <defaults>
</compile_context>

<pallas_src>
import math

import jax
import jax.numpy as jnp
from jax.experimental import pallas as pl
from jax.experimental.pallas import tpu as pltpu


def _round_up(a, m):
    return (a + m - 1) // m * m


def _fusion_kernel(x_ref, ctx_ref, t_ref, wx_ref, wc_ref, wt_ref, b_ref, o_ref):
    # Packed pre-activation z columns: [ y1 | y2 | g1_pre | g2_pre ], each dim_out
    # wide -> 4*dim_out lanes (lane-dense for dim_out=32).  f32 accumulation.
    z = jnp.dot(x_ref[...], wx_ref[...], preferred_element_type=jnp.float32)
    z = z + jnp.dot(ctx_ref[...], wc_ref[...], preferred_element_type=jnp.float32)

    # Time-embedding contribution (K = dim_time = 3): unrolled VPU broadcast-FMAs
    # in f32 instead of a nearly-empty MXU push.
    t = t_ref[...]                                    # (tile, dim_time) f32
    for k in range(t_ref.shape[-1]):
        z = z + t[:, k:k + 1] * wt_ref[k:k + 1, :]    # (tile,1)*(1,4d) -> (tile,4d)

    z = z + b_ref[...]                                # (1, 4d) bias broadcast

    d = o_ref.shape[-1]
    y1 = z[:, 0 * d:1 * d]
    y2 = z[:, 1 * d:2 * d]
    g1 = jax.nn.sigmoid(z[:, 2 * d:3 * d])
    g2 = jax.nn.sigmoid(z[:, 3 * d:4 * d])
    o_ref[...] = (y1 * g1 + y2 * g2).astype(o_ref.dtype)


def adaptive_fusion(ctx, x, timeemb, params, *, tile_n=512,
                    matmul_dtype=jnp.bfloat16):
    """ctx: (..., dim_ctx), x: (..., dim_in), timeemb: (..., dim_time)."""
    assert ctx.shape[:-1] == x.shape[:-1] == timeemb.shape[:-1]
    lead = x.shape[:-1]
    dim_in = x.shape[-1]
    dim_ctx = ctx.shape[-1]
    dim_time = timeemb.shape[-1]
    dim_out = params["w1"].shape[1]
    out_dtype = x.dtype

    n = math.prod(lead) if lead else 1

    # Effective tile: multiple of 16 (bf16 sublane packing), capped near n so tiny
    # problems don't over-pad.  For v7x, choose tile_n <= n/2 so the parallel grid
    # axis has >= 2 steps and shards across both TensorCores.
    tile = max(16, min(int(tile_n), _round_up(n, 16)))
    tile = _round_up(tile, 16)
    n_pad = _round_up(n, tile)
    grid = n_pad // tile

    def prep(a, feat, dtype):
        a = a.reshape(n, feat)
        if n_pad > n:
            a = jnp.pad(a, ((0, n_pad - n), (0, 0)))
        return a.astype(dtype)

    x2 = prep(x, dim_in, matmul_dtype)
    ctx2 = prep(ctx, dim_ctx, matmul_dtype)
    t2 = prep(timeemb, dim_time, jnp.float32)      # tiny; keep f32 for VPU FMAs

    # --- pack weights column-wise: [ y1 | y2 | g1_pre | g2_pre ] --------------
    d = dim_out
    f32 = jnp.float32
    zx = jnp.zeros((dim_in, d), f32)
    zc = jnp.zeros((dim_ctx, d), f32)
    zt = jnp.zeros((dim_time, d), f32)
    w_x = jnp.concatenate(
        [params["w1"].astype(f32), zx, zx, params["wg2_x"].astype(f32)],
        axis=1).astype(matmul_dtype)                                   # (dim_in, 4d)
    w_c = jnp.concatenate(
        [zc, params["w2"].astype(f32), params["wg1_ctx"].astype(f32), zc],
        axis=1).astype(matmul_dtype)                                   # (dim_ctx, 4d)
    w_t = jnp.concatenate(
        [zt, zt, params["wg1_t"].astype(f32), params["wg2_t"].astype(f32)],
        axis=1).astype(f32)                                            # (dim_time, 4d)
    b_p = jnp.concatenate(
        [params["b1"], params["b2"], params["bg1"], params["bg2"]],
        axis=1).astype(f32)                                            # (1, 4d)

    row_spec = lambda feat: pl.BlockSpec((tile, feat), lambda i: (i, 0))
    full_spec = lambda r, c: pl.BlockSpec((r, c), lambda i: (0, 0))

    itemsize = lambda a: a.size * a.dtype.itemsize
    cost = pl.CostEstimate(
        flops=2 * n_pad * (dim_in + dim_ctx + dim_time) * 4 * dim_out,
        transcendentals=2 * n_pad * dim_out,
        bytes_accessed=(itemsize(x2) + itemsize(ctx2) + itemsize(t2)
                        + itemsize(w_x) + itemsize(w_c) + itemsize(w_t)
                        + itemsize(b_p)
                        + n_pad * dim_out * jnp.dtype(out_dtype).itemsize),
    )

    out = pl.pallas_call(
        _fusion_kernel,
        out_shape=jax.ShapeDtypeStruct((n_pad, dim_out), out_dtype),
        grid_spec=pltpu.PrefetchScalarGridSpec(
            num_scalar_prefetch=0,
            grid=(grid,),
            in_specs=[
                row_spec(dim_in),                # x
                row_spec(dim_ctx),               # ctx
                row_spec(dim_time),              # timeemb
                full_spec(dim_in, 4 * d),        # packed x-weights
                full_spec(dim_ctx, 4 * d),       # packed ctx-weights
                full_spec(dim_time, 4 * d),      # packed t-weights (f32)
                full_spec(1, 4 * d),             # packed biases (f32)
            ],
            out_specs=pl.BlockSpec((tile, dim_out), lambda i: (i, 0)),
        ),
        compiler_params=pltpu.CompilerParams(
            dimension_semantics=("parallel",)),
        cost_estimate=cost,
    )(x2, ctx2, t2, w_x, w_c, w_t, b_p)

    out = out[:n]
    return out.reshape(*lead, dim_out)


def init_params(key, dim_in, dim_out, dim_ctx, dim_time=3, dtype=jnp.float32):
    ks = jax.random.split(key, 8)
    scale = 0.1
    # weights stored as (in_features, out_features)
    w1 = scale * jax.random.normal(ks[0], (dim_in, dim_out), dtype)
    b1 = scale * jax.random.normal(ks[1], (1, dim_out), dtype)
    w2 = scale * jax.random.normal(ks[2], (dim_ctx, dim_out), dtype)
    b2 = scale * jax.random.normal(ks[3], (1, dim_out), dtype)
    # hyper_gate1: Linear(dim_ctx + dim_time, dim_out), input = cat(ctx, t)
    wg1 = scale * jax.random.normal(ks[4], (dim_ctx + dim_time, dim_out), dtype)
    bg1 = scale * jax.random.normal(ks[5], (1, dim_out), dtype)
    # hyper_gate2: Linear(dim_in + dim_time, dim_out), input = cat(x, t)
    wg2 = scale * jax.random.normal(ks[6], (dim_in + dim_time, dim_out), dtype)
    bg2 = scale * jax.random.normal(ks[7], (1, dim_out), dtype)
    return {
        "w1": w1, "b1": b1,
        "w2": w2, "b2": b2,
        "wg1_ctx": wg1[:dim_ctx], "wg1_t": wg1[dim_ctx:], "bg1": bg1,
        "wg2_x": wg2[:dim_in], "wg2_t": wg2[dim_in:], "bg2": bg2,
    }


def adaptive_fusion_ref(ctx, x, timeemb, params):
    in1 = jnp.concatenate([ctx, timeemb], axis=-1)
    in2 = jnp.concatenate([x, timeemb], axis=-1)
    wg1 = jnp.concatenate([params["wg1_ctx"], params["wg1_t"]], axis=0)
    wg2 = jnp.concatenate([params["wg2_x"], params["wg2_t"]], axis=0)
    gate1 = jax.nn.sigmoid(in1 @ wg1 + params["bg1"][0])
    gate2 = jax.nn.sigmoid(in2 @ wg2 + params["bg2"][0])
    return ((x @ params["w1"] + params["b1"][0]) * gate1
            + (ctx @ params["w2"] + params["b2"][0]) * gate2)


if __name__ == "__main__":
    # Small shapes; n = batch*seq = 180 is NOT a multiple of the tile, exercising
    # the cdiv + padding path, and tile_n=64 gives a 3-step parallel grid.
    batch, seq = 2, 90
    dim_in, dim_out, dim_ctx, dim_time = 32, 32, 16, 3

    key = jax.random.PRNGKey(0)
    kp, kc, kx, kt = jax.random.split(key, 4)

    params = init_params(kp, dim_in, dim_out, dim_ctx, dim_time)
    ctx = jax.random.normal(kc, (batch, seq, dim_ctx), jnp.float32)
    x = jax.random.normal(kx, (batch, seq, dim_in), jnp.float32)
    timeemb = jax.random.normal(kt, (batch, seq, dim_time), jnp.float32)

    out = adaptive_fusion(ctx, x, timeemb, params, tile_n=64)
    out = jax.block_until_ready(out)

    ref = adaptive_fusion_ref(ctx, x, timeemb, params)
    assert out.shape == (batch, seq, dim_out)
    err = float(jnp.max(jnp.abs(out - ref)))
    # bf16 matmul inputs (f32 accumulation) -> loosened tolerance vs f32 reference.
    assert err < 5e-2, f"mismatch vs reference: max abs err = {err}"

    print("KERNEL_OK")
</pallas_src>

<mosaic_0001>
module attributes {stable_mosaic.version = 11 : i64} {
  func.func @_fusion_kernel(%arg0: i32, %arg1: memref<64x32xbf16, #tpu.memory_space<vmem>>, %arg2: memref<64x16xbf16, #tpu.memory_space<vmem>>, %arg3: memref<64x3xf32, #tpu.memory_space<vmem>>, %arg4: memref<32x128xbf16, #tpu.memory_space<vmem>>, %arg5: memref<16x128xbf16, #tpu.memory_space<vmem>>, %arg6: memref<3x128xf32, #tpu.memory_space<vmem>>, %arg7: memref<1x128xf32, #tpu.memory_space<vmem>>, %arg8: memref<64x32xf32, #tpu.memory_space<vmem>>) attributes {dimension_semantics = [#tpu.dimension_semantics<parallel>], iteration_bounds = array<i64: 3>, scalar_prefetch = 0 : i64, scratch_operands = 0 : i64, tpu.core_type = #tpu.core_type<tc>, window_params = [{transform_indices = @transform_0, window_bounds = array<i64: 64, 32>}, {transform_indices = @transform_1, window_bounds = array<i64: 64, 16>}, {transform_indices = @transform_2, window_bounds = array<i64: 64, 3>}, {pipeline_mode = #tpu.pipeline_mode<synchronous>, transform_indices = @transform_3, window_bounds = array<i64: 32, 128>}, {pipeline_mode = #tpu.pipeline_mode<synchronous>, transform_indices = @transform_4, window_bounds = array<i64: 16, 128>}, {pipeline_mode = #tpu.pipeline_mode<synchronous>, transform_indices = @transform_5, window_bounds = array<i64: 3, 128>}, {pipeline_mode = #tpu.pipeline_mode<synchronous>, transform_indices = @transform_6, window_bounds = array<i64: 1, 128>}, {transform_indices = @transform_7, window_bounds = array<i64: 64, 32>}]} {
    %c0 = arith.constant 0 : index
    %c0_0 = arith.constant 0 : index
    %0 = vector.load %arg1[%c0, %c0_0] : memref<64x32xbf16, #tpu.memory_space<vmem>>, vector<64x32xbf16>
    %c0_1 = arith.constant 0 : index
    %c0_2 = arith.constant 0 : index
    %1 = vector.load %arg4[%c0_1, %c0_2] : memref<32x128xbf16, #tpu.memory_space<vmem>>, vector<32x128xbf16>
    %cst = arith.constant dense<0.000000e+00> : vector<64x128xf32>
    %2 = tpu.matmul %0, %1, %cst {dimension_numbers = #tpu.dot_dimension_numbers<[1], [0], [0], [1], [0, 0, 1, 1], [], []>} : vector<64x32xbf16>, vector<32x128xbf16>, vector<64x128xf32> -> vector<64x128xf32>
    %c0_3 = arith.constant 0 : index
    %c0_4 = arith.constant 0 : index
    %3 = vector.load %arg2[%c0_3, %c0_4] : memref<64x16xbf16, #tpu.memory_space<vmem>>, vector<64x16xbf16>
    %c0_5 = arith.constant 0 : index
    %c0_6 = arith.constant 0 : index
    %4 = vector.load %arg5[%c0_5, %c0_6] : memref<16x128xbf16, #tpu.memory_space<vmem>>, vector<16x128xbf16>
    %cst_7 = arith.constant dense<0.000000e+00> : vector<64x128xf32>
    %5 = tpu.matmul %3, %4, %cst_7 {dimension_numbers = #tpu.dot_dimension_numbers<[1], [0], [0], [1], [0, 0, 1, 1], [], []>} : vector<64x16xbf16>, vector<16x128xbf16>, vector<64x128xf32> -> vector<64x128xf32>
    %6 = arith.addf %2, %5 : vector<64x128xf32>
    %c0_8 = arith.constant 0 : index
    %c0_9 = arith.constant 0 : index
    %7 = vector.load %arg3[%c0_8, %c0_9] : memref<64x3xf32, #tpu.memory_space<vmem>>, vector<64x3xf32>
    %8 = vector.extract_strided_slice %7 {offsets = [0, 0], sizes = [64, 1], strides = [1, 1]} : vector<64x3xf32> to vector<64x1xf32>
    %c0_10 = arith.constant 0 : index
    %c0_11 = arith.constant 0 : index
    %9 = vector.load %arg6[%c0_10, %c0_11] : memref<3x128xf32, #tpu.memory_space<vmem>>, vector<1x128xf32>
    %10 = vector.broadcast %8 : vector<64x1xf32> to vector<64x128xf32>
    %11 = vector.broadcast %9 : vector<1x128xf32> to vector<64x128xf32>
    %12 = arith.mulf %10, %11 : vector<64x128xf32>
    %13 = arith.addf %6, %12 : vector<64x128xf32>
    %14 = vector.extract_strided_slice %7 {offsets = [0, 1], sizes = [64, 1], strides = [1, 1]} : vector<64x3xf32> to vector<64x1xf32>
    %c1 = arith.constant 1 : index
    %c0_12 = arith.constant 0 : index
    %15 = vector.load %arg6[%c1, %c0_12] : memref<3x128xf32, #tpu.memory_space<vmem>>, vector<1x128xf32>
    %16 = vector.broadcast %14 : vector<64x1xf32> to vector<64x128xf32>
    %17 = vector.broadcast %15 : vector<1x128xf32> to vector<64x128xf32>
    %18 = arith.mulf %16, %17 : vector<64x128xf32>
    %19 = arith.addf %13, %18 : vector<64x128xf32>
    %20 = vector.extract_strided_slice %7 {offsets = [0, 2], sizes = [64, 1], strides = [1, 1]} : vector<64x3xf32> to vector<64x1xf32>
    %c2 = arith.constant 2 : index
    %c0_13 = arith.constant 0 : index
    %21 = vector.load %arg6[%c2, %c0_13] : memref<3x128xf32, #tpu.memory_space<vmem>>, vector<1x128xf32>
    %22 = vector.broadcast %20 : vector<64x1xf32> to vector<64x128xf32>
    %23 = vector.broadcast %21 : vector<1x128xf32> to vector<64x128xf32>
    %24 = arith.mulf %22, %23 : vector<64x128xf32>
    %25 = arith.addf %19, %24 : vector<64x128xf32>
    %c0_14 = arith.constant 0 : index
    %c0_15 = arith.constant 0 : index
    %26 = vector.load %arg7[%c0_14, %c0_15] : memref<1x128xf32, #tpu.memory_space<vmem>>, vector<1x128xf32>
    %27 = vector.broadcast %26 : vector<1x128xf32> to vector<64x128xf32>
    %28 = arith.addf %25, %27 : vector<64x128xf32>
    %29 = vector.extract_strided_slice %28 {offsets = [0, 0], sizes = [64, 32], strides = [1, 1]} : vector<64x128xf32> to vector<64x32xf32>
    %30 = vector.extract_strided_slice %28 {offsets = [0, 32], sizes = [64, 32], strides = [1, 1]} : vector<64x128xf32> to vector<64x32xf32>
    %31 = vector.extract_strided_slice %28 {offsets = [0, 64], sizes = [64, 32], strides = [1, 1]} : vector<64x128xf32> to vector<64x32xf32>
    %32 = arith.negf %31 : vector<64x32xf32>
    %33 = math.exp %32 : vector<64x32xf32>
    %cst_16 = arith.constant 1.000000e+00 : f32
    %34 = vector.broadcast %cst_16 : f32 to vector<64x32xf32>
    %35 = arith.addf %34, %33 : vector<64x32xf32>
    %36 = arith.divf %34, %35 : vector<64x32xf32>
    %37 = vector.extract_strided_slice %28 {offsets = [0, 96], sizes = [64, 32], strides = [1, 1]} : vector<64x128xf32> to vector<64x32xf32>
    %38 = arith.negf %37 : vector<64x32xf32>
    %39 = math.exp %38 : vector<64x32xf32>
    %cst_17 = arith.constant 1.000000e+00 : f32
    %40 = vector.broadcast %cst_17 : f32 to vector<64x32xf32>
    %41 = arith.addf %40, %39 : vector<64x32xf32>
    %42 = arith.divf %40, %41 : vector<64x32xf32>
    %43 = arith.mulf %29, %36 : vector<64x32xf32>
    %44 = arith.mulf %30, %42 : vector<64x32xf32>
    %45 = arith.addf %43, %44 : vector<64x32xf32>
    %c0_18 = arith.constant 0 : index
    %c0_19 = arith.constant 0 : index
    %46 = vector.load %arg8[%c0_18, %c0_19] : memref<64x32xf32, #tpu.memory_space<vmem>>, vector<64x32xf32>
    tpu.vector_store %arg8[%c0_18, %c0_19], %45 {strides = array<i32>} : memref<64x32xf32, #tpu.memory_space<vmem>>, vector<64x32xf32>,
    return
  }
  func.func @transform_0(%arg0: i32) -> (i32, i32) {
    %c0_i32 = arith.constant 0 : i32
    %c0_i32_0 = arith.constant 0 : i32
    return %arg0, %c0_i32 : i32, i32
  }
  func.func @transform_1(%arg0: i32) -> (i32, i32) {
    %c0_i32 = arith.constant 0 : i32
    %c0_i32_0 = arith.constant 0 : i32
    return %arg0, %c0_i32 : i32, i32
  }
  func.func @transform_2(%arg0: i32) -> (i32, i32) {
    %c0_i32 = arith.constant 0 : i32
    %c0_i32_0 = arith.constant 0 : i32
    return %arg0, %c0_i32 : i32, i32
  }
  func.func @transform_3(%arg0: i32) -> (i32, i32) {
    %c0_i32 = arith.constant 0 : i32
    %c0_i32_0 = arith.constant 0 : i32
    %c0_i32_1 = arith.constant 0 : i32
    return %c0_i32, %c0_i32_0 : i32, i32
  }
  func.func @transform_4(%arg0: i32) -> (i32, i32) {
    %c0_i32 = arith.constant 0 : i32
    %c0_i32_0 = arith.constant 0 : i32
    %c0_i32_1 = arith.constant 0 : i32
    return %c0_i32, %c0_i32_0 : i32, i32
  }
  func.func @transform_5(%arg0: i32) -> (i32, i32) {
    %c0_i32 = arith.constant 0 : i32
    %c0_i32_0 = arith.constant 0 : i32
    %c0_i32_1 = arith.constant 0 : i32
    return %c0_i32, %c0_i32_0 : i32, i32
  }
  func.func @transform_6(%arg0: i32) -> (i32, i32) {
    %c0_i32 = arith.constant 0 : i32
    %c0_i32_0 = arith.constant 0 : i32
    %c0_i32_1 = arith.constant 0 : i32
    return %c0_i32, %c0_i32_0 : i32, i32
  }
  func.func @transform_7(%arg0: i32) -> (i32, i32) {
    %c0_i32 = arith.constant 0 : i32
    %c0_i32_0 = arith.constant 0 : i32
    return %arg0, %c0_i32 : i32, i32
  }
}

</mosaic_0001>

<bundles_post_ra>
// kernel: tpu_custom_call.1
= control target key start
LH: loop header
LB: loop body
LE: loop exit
PB: predicated region body
PF: predicated region fallthrough
CT: control target
= control target key end

     0   :  { %s1171_s24 = smov 0   ;;  %s1284_s0 = inlined_call_operand.vmem [shape: bf16[192,32], index: 0, kind: input, shape index: {}]   ;;  %s1285_s1 = inlined_call_operand.vmem [shape: bf16[192,16], index: 1, kind: input, shape index: {}]   ;;  %s1286_s2 = inlined_call_operand.vmem [shape: f32[192,3], index: 2, kind: input, shape index: {}]   ;;  %s1287_s3 = inlined_call_operand.vmem [shape: bf16[32,128], index: 3, kind: input, shape index: {}]   ;;  %s1288_s4 = inlined_call_operand.vmem [shape: bf16[16,128], index: 4, kind: input, shape index: {}]   ;;  %s1289_s5 = inlined_call_operand.vmem [shape: f32[3,128], index: 5, kind: input, shape index: {}]   ;;  %s1290_s6 = inlined_call_operand.vmem [shape: f32[1,128], index: 6, kind: input, shape index: {}]   ;;  %s1291_s7 = inlined_call_operand.vmem [shape: f32[192,32], index: 7, kind: output, shape index: {}]  }
   0x1 LB: > { %s969_s25 = sadd.s32 4294967295, %s1124_s24   ;;  %p973_p0 = scmp.ge.s32.totalorder %s1124_s24, 1  ;;  %s1124_s24 = sphi %s1171_s24, %s17_s24  }
   0x2   : > { %p260_p1 = scmp.lt.s32.totalorder %s1124_s24, 4 }
   0x4   : > { %p261_p2 = pnand %p973_p0, %p260_p1 }
   0x5   : > { %v1075_v0 = vld [vmem:[%s1287_s3] sm:$0xff] (!%p261_p2)   ;;  %s974_s28 = sshll.u32 (!%p261_p2), %s969_s25, 3  ;;  %v1077_v2 = vld [vmem:[%s1287_s3 + $0x8] sm:$0xff] (!%p261_p2)   ;;  %v1126_v3 = vmov (!%p261_p2), 0   ;;  %vm375_vm0 = vcmask (!%p261_p2), 130048   ;;  %vm485_vm1 = vcmask (!%p261_p2), 261120  }
   0x6   : > { %264 = sbr.rel (%p261_p2) target bundleno = 517 (0x205), region = 48  ;;  %v1076_v1 = vld [vmem:[%s1288_s4] sm:$0xff] (!%p261_p2)   ;;  %p303_p3 = scmp.lt.s32.totalorder (!%p261_p2), %s974_s28, 23  ;;  %1036 = vmatprep.subr.bf16.mxu0 (!%p261_p2), %v1075_v0  ;;  %1070 = vset.pattern.permute.xlu1 (!%p261_p2), %v1126_v3  ;;  %v1127_v20 = vmov (!%p261_p2), 1   ;;  %v1128_v21 = vmov (!%p261_p2), 2  }
   0x7   : > { %1037 = vmatpush3.bf16.msra.mxu0 (!%p261_p2), %v1075_v0  ;;  %1026 = vmatprep.subr.bf16.mxu1 (!%p261_p2), %v1076_v1  ;;  %v1001_v41 = vld [vmem:[%s1289_s5] ss:$0 sm:$0xff] (!%p261_p2)  ;;  %v1002_v47 = vld [vmem:[%s1289_s5 + $0x1] ss:$0 sm:$0xff] (!%p261_p2)  ;;  %v1222_v59 = vld [vmem:[%s1289_s5 + $0x2] ss:$0 sm:$0xff] (!%p261_p2) }
   0x8   : > { %1038 = vmatprep.subr.bf16.mxu0 (!%p261_p2), %v1077_v2  ;;  %1027 = vmatpush3.bf16.msra.mxu1 (!%p261_p2), %v1076_v1  ;;  %s1129_s8 = smov (!%p261_p2), 64   ;;  %s1130_s9 = smov (!%p261_p2), 96  }
   0x9   : > { %1069 = vset.pattern.permute.xlu0 (!%p261_p2), %v1126_v3 }
   0xb   : > { %1039 = vmatpush3.bf16.msra.mxu0 (!%p261_p2), %v1077_v2 }
   0xd   : > { %s1293_s28 = smov (!%p303_p3, %s974_s28), 23 }
   0xe   : > { %s975_s10 = sshll.u32 %s1293_s28, 2  ;;  %s979_s17 = sshll.u32 %s1293_s28, 3 }
   0xf   : > { %s312_s13 = scalar_lea.vmem %s1285_s1, %s975_s10  ;;  %s306_s16 = scalar_lea.vmem %s1284_s0, %s975_s10 }
  0x10   : > { %v1078_v4 = vld [vmem:[%s312_s13] sm:$0xff]   ;;  %v1080_v6 = vld [vmem:[%s312_s13 + $0x8] sm:$0xff]   ;;  %v1082_v8 = vld [vmem:[%s312_s13 + $0x10] sm:$0xff]   ;;  %s318_s20 = scalar_lea.vmem %s1286_s2, %s979_s17  ;;  %s324_s12 = scalar_lea.vmem %s1291_s7, %s979_s17 }
  0x11   : > { %v1079_v5 = vld [vmem:[%s306_s16] sm:$0xff]   ;;  %1028 = vmatprep.mubr.msk.bf16.mxu1 %vm375_vm0, %v1078_v4  ;;  %v1081_v7 = vld [vmem:[%s306_s16 + $0x8] sm:$0xff]   ;;  %v1083_v9 = vld [vmem:[%s306_s16 + $0x10] sm:$0xff]  }
  0x12   : > { %1040 = vmatprep.mubr.msk.bf16.mxu0 %vm485_vm1, %v1079_v5  ;;  %1029 = vmatmul.mubr.msk.bf16.vlgmr.msra.gmra.mrb[0].mxu1 %vm375_vm0, %v1080_v6  ;;  %v1084_v10 = vld [vmem:[%s312_s13 + $0x18] sm:$0xff]   ;;  %v565_v11 = vld [vmem:[%s318_s20 + $0x10] sm:$0xff]  ;;  %v563_v13 = vld [vmem:[%s318_s20] sm:$0xff] }
  0x13   : > { %1041 = vmatmul.mubr.msk.bf16.vlgmr.msra.gmra.mrb[0].mxu0 %vm485_vm1, %v1081_v7  ;;  %1032 = vmatprep.mubr.msk.bf16.mxu1 %vm375_vm0, %v1082_v8  ;;  %v1085_v12 = vld [vmem:[%s306_s16 + $0x18] sm:$0xff]   ;;  %v564_v15 = vld [vmem:[%s318_s20 + $0x8] sm:$0xff]  ;;  %v567_v17 = vld [vmem:[%s318_s20 + $0x20] sm:$0xff] }
  0x14   : > { %1044 = vmatprep.mubr.msk.bf16.mxu0 %vm485_vm1, %v1083_v9  ;;  %584 = vperm.xlu1 %1070, %v565_v11   ;;  %v566_v14 = vld [vmem:[%s318_s20 + $0x18] sm:$0xff]  ;;  %v568_v16 = vld [vmem:[%s318_s20 + $0x28] sm:$0xff]  ;;  %v569_v19 = vld [vmem:[%s318_s20 + $0x30] sm:$0xff] }
  0x15   : > { %574 = vperm.xlu0 %1069, %v563_v13   ;;  %v570_v18 = vld [vmem:[%s318_s20 + $0x38] sm:$0xff] }
  0x18   : > { %589 = vperm.xlu1 %1070, %v566_v14  }
  0x19   : > { %579 = vperm.xlu0 %1069, %v564_v15  }
  0x1a   : > { %1033 = vmatmul.mubr.msk.bf16.gmra.mrb[4].mxu1 %vm375_vm0, %v1084_v10 }
  0x1b   : > { %1045 = vmatmul.mubr.msk.bf16.gmra.mrb[4].mxu0 %vm485_vm1, %v1085_v12 }
  0x1c   : > { %599 = vperm.xlu1 %1070, %v568_v16  }
  0x1d   : > { %594 = vperm.xlu0 %1069, %v567_v17  }
  0x20   : > { %609 = vperm.xlu1 %1070, %v570_v18  }
  0x21   : > { %604 = vperm.xlu0 %1069, %v569_v19  }
  0x24   : > { %1072 = vset.pattern.permute.xlu1 %v1127_v20 }
  0x25   : > { %638 = vperm.xlu1 %1072, %v564_v15   ;;  %1071 = vset.pattern.permute.xlu0 %v1127_v20 }
  0x26   : > { %634 = vperm.xlu0 %1071, %v563_v13  }
  0x29   : > { %642 = vperm.xlu1 %1072, %v565_v11  }
  0x2a   : > { %646 = vperm.xlu0 %1071, %v566_v14  }
  0x2d   : > { %650 = vperm.xlu1 %1072, %v567_v17  }
  0x2e   : > { %654 = vperm.xlu0 %1071, %v568_v16  }
  0x31   : > { %658 = vperm.xlu1 %1072, %v569_v19  }
  0x32   : > { %662 = vperm.xlu0 %1071, %v570_v18  }
  0x35   : > { %1073 = vset.pattern.permute.xlu1 %v1128_v21 }
  0x36   : > { %687 = vperm.xlu1 %1073, %v563_v13   ;;  %1074 = vset.pattern.permute.xlu0 %v1128_v21 }
  0x37   : > { %691 = vperm.xlu0 %1074, %v564_v15  }
  0x3a   : > { %695 = vperm.xlu1 %1073, %v565_v11  }
  0x3b   : > { %703 = vperm.xlu0 %1074, %v567_v17  }
  0x3e   : > { %699 = vperm.xlu1 %1073, %v566_v14   ;;  %v1004_v14 = vld [vmem:[%s1290_s6] ss:$0 sm:$0xff] }
  0x3f   : > { %711 = vperm.xlu0 %1074, %v569_v19  }
  0x42   : > { %707 = vperm.xlu1 %1073, %v568_v16  }
  0x46   : > { %715 = vperm.xlu1 %1073, %v570_v18  }
  0x93   : > { %v585_v22 = vpop.permute.xlu1 %584 }
  0x94   : > { %v575_v24 = vpop.permute.xlu0 %574  ;;  %v618_v45 = vmul.f32 %v1001_v41, %v585_v22 }
  0x95   : > { %v616_v46 = vmul.f32 %v1001_v41, %v575_v24 }
  0x97   : > { %v590_v23 = vpop.permute.xlu1 %589 }
  0x98   : > { %v580_v26 = vpop.permute.xlu0 %579  ;;  %v619_v50 = vmul.f32 %v1001_v41, %v590_v23 }
  0x99   : > { %v617_v52 = vmul.f32 %v1001_v41, %v580_v26 }
  0x9b   : > { %v600_v25 = vpop.permute.xlu1 %599 }
  0x9c   : > { %v595_v28 = vpop.permute.xlu0 %594  ;;  %v1217_v51 = vmul.f32 %v1001_v41, %v600_v25 }
  0x9d   : > { %v620_v57 = vmul.f32 %v1001_v41, %v595_v28 }
  0x9f   : > { %v610_v27 = vpop.permute.xlu1 %609 }
  0xa0   : > { %v605_v30 = vpop.permute.xlu0 %604  ;;  %v623_v56 = vmul.f32 %v1001_v41, %v610_v27 }
  0xa1   : > { %v622_v58 = vmul.f32 %v1001_v41, %v605_v30 }
  0xa4   : > { %v639_v29 = vpop.permute.xlu1 %638 }
  0xa5   : > { %v635_v32 = vpop.permute.xlu0 %634  ;;  %v670_v63 = vmul.f32 %v1002_v47, %v639_v29 }
  0xa6   : > { %v669_v4 = vmul.f32 %v1002_v47, %v635_v32 }
  0xa8   : > { %v643_v31 = vpop.permute.xlu1 %642 }
  0xa9   : > { %v647_v34 = vpop.permute.xlu0 %646  ;;  %v671_v0 = vmul.f32 %v1002_v47, %v643_v31 }
  0xaa   : > { %v672_v5 = vmul.f32 %v1002_v47, %v647_v34 }
  0xac   : > { %v651_v33 = vpop.permute.xlu1 %650 }
  0xad   : > { %v655_v36 = vpop.permute.xlu0 %654  ;;  %v673_v8 = vmul.f32 %v1002_v47, %v651_v33 }
  0xae   : > { %v674_v18 = vmul.f32 %v1002_v47, %v655_v36 }
  0xb0   : > { %v659_v35 = vpop.permute.xlu1 %658 }
  0xb1   : > { %v663_v38 = vpop.permute.xlu0 %662  ;;  %v675_v24 = vmul.f32 %v1002_v47, %v659_v35 }
  0xb2   : > { %v676_v25 = vmul.f32 %v1002_v47, %v663_v38 }
  0xb5   : > { %v688_v37 = vpop.permute.xlu1 %687 }
  0xb6   : > { %v692_v39 = vpop.permute.xlu0 %691  ;;  %v722_v12 = vmul.f32 %v1222_v59, %v688_v37 }
  0xb7   : > { %v723_v16 = vmul.f32 %v1222_v59, %v692_v39 }
  0xb9   : > { %v696_v40 = vpop.permute.xlu1 %695 }
  0xba   : > { %v704_v42 = vpop.permute.xlu0 %703  ;;  %v724_v9 = vmul.f32 %v1222_v59, %v696_v40 }
  0xbb   : > { %v726_v32 = vmul.f32 %v1222_v59, %v704_v42 }
  0xbd   : > { %v700_v43 = vpop.permute.xlu1 %699 }
  0xbe   : > { %v725_v19 = vmul.f32 %v1222_v59, %v700_v43  ;;  %v712_v23 = vpop.permute.xlu0 %711 }
  0xbf   : > { %v728_v35 = vmul.f32 %v1222_v59, %v712_v23 }
  0xc1   : > { %v708_v13 = vpop.permute.xlu1 %707 }
  0xe5   : > { %v1030_v44 = vpop.f32.mrb[0].mxu1 }
  0xe6   : > { %v1042_v48 = vpop.f32.mrb[0].mxu0  ;;  %v422_v49 = vpop.f32.mrb[1].mxu1 }
  0xe7   : > { %v541_v53 = vadd.f32 %v1042_v48, %v1030_v44  ;;  %v532_v54 = vpop.f32.mrb[1].mxu0  ;;  %v1031_v55 = vpop.f32.mrb[2].mxu1 }
  0xe8   : > { %v533_v60 = vadd.f32 %v532_v54, %v422_v49  ;;  %v1043_v61 = vpop.f32.mrb[2].mxu0  ;;  %v425_v62 = vpop.f32.mrb[3].mxu1 }
  0xe9   : > { %v626_v1 = vadd.f32 %v618_v45, %v541_v53  ;;  %v544_v2 = vadd.f32 %v1043_v61, %v1031_v55  ;;  %v535_v3 = vpop.f32.mrb[3].mxu0  ;;  %v716_v48 = vpop.permute.xlu1 %715 }
  0xea   : > { %v624_v6 = vadd.f32 %v616_v46, %v533_v60  ;;  %v536_v7 = vadd.f32 %v535_v3, %v425_v62  ;;  %v729_v62 = vmul.f32 %v1222_v59, %v716_v48 }
  0xeb   : > { %v679_v10 = vadd.f32 %v671_v0, %v626_v1  ;;  %v627_v11 = vadd.f32 %v619_v50, %v544_v2  ;;  %v727_v1 = vmul.f32 %v1222_v59, %v708_v13 }
  0xec   : > { %v677_v15 = vadd.f32 %v669_v4, %v624_v6  ;;  %v625_v17 = vadd.f32 %v617_v52, %v536_v7 }
  0xed   : > { %v732_v20 = vadd.f32 %v724_v9, %v679_v10  ;;  %v680_v21 = vadd.f32 %v672_v5, %v627_v11  ;;  %v1034_v22 = vpop.f32.mrb[4].mxu1 }
  0xee   : > { %v730_v26 = vadd.f32 %v722_v12, %v677_v15  ;;  %v678_v27 = vadd.f32 %v670_v63, %v625_v17  ;;  %v1046_v28 = vpop.f32.mrb[4].mxu0  ;;  %v438_v29 = vpop.f32.mrb[5].mxu1 }
  0xef   : > { %v1231_v30 = vadd.f32 %v1004_v14, %v732_v20  ;;  %v733_v31 = vadd.f32 %v725_v19, %v680_v21  ;;  %v557_v33 = vadd.f32 %v1046_v28, %v1034_v22  ;;  %v548_v34 = vpop.f32.mrb[5].mxu0  ;;  %v1035_v36 = vpop.f32.mrb[6].mxu1 }
  0xf0   : > { %v1234_v37 = vadd.f32 %v1004_v14, %v730_v26  ;;  %v731_v39 = vadd.f32 %v723_v16, %v678_v27  ;;  %v549_v40 = vadd.f32 %v548_v34, %v438_v29  ;;  %v1047_v41 = vpop.f32.mrb[6].mxu0  ;;  %v441_v38 = vpop.f32.mrb[7].mxu1 }
  0xf1   : > { %v1007_v43 = vmul.f32 -1.442695, %v1231_v30  ;;  %v1238_v44 = vadd.f32 %v1004_v14, %v733_v31  ;;  %v630_v45 = vadd.f32 %v622_v58, %v557_v33  ;;  %v560_v46 = vadd.f32 %v1047_v41, %v1035_v36  ;;  %v551_v47 = vpop.f32.mrb[7].mxu0 }
  0xf2   : > { %v1005_v42 = vmul.f32 -1.442695, %v1234_v37  ;;  %v1241_v49 = vadd.f32 %v1004_v14, %v731_v39  ;;  %v628_v50 = vadd.f32 %v620_v57, %v549_v40  ;;  %v552_v52 = vadd.f32 %v551_v47, %v441_v38 }
  0xf3   : > { %1086 = vpow2.f32 %v1007_v43  ;;  %v1008_v53 = vmul.f32 -1.442695, %v1238_v44  ;;  %v631_v54 = vadd.f32 %v623_v56, %v560_v46  ;;  %v683_v55 = vadd.f32 %v675_v24, %v630_v45 }
  0xf4   : > { %1088 = vpow2.f32 %v1005_v42  ;;  %v1006_v60 = vmul.f32 -1.442695, %v1241_v49  ;;  %v681_v61 = vadd.f32 %v673_v8, %v628_v50  ;;  %v629_v58 = vadd.f32 %v1217_v51, %v552_v52 }
  0xf5   : > { %1090 = vpow2.f32 %v1008_v53  ;;  %v684_v63 = vadd.f32 %v676_v25, %v631_v54  ;;  %v736_v0 = vadd.f32 %v728_v35, %v683_v55 }
  0xf6   : > { %1092 = vpow2.f32 %v1006_v60  ;;  %v734_v57 = vadd.f32 %v726_v32, %v681_v61  ;;  %v682_v2 = vadd.f32 %v674_v18, %v629_v58 }
  0xf7   : > { %v737_v3 = vadd.f32 %v729_v62, %v684_v63  ;;  %v1248_v4 = vadd.f32 %v1004_v14, %v736_v0 }
  0xf8   : > { %v1250_v56 = vadd.f32 %v1004_v14, %v734_v57  ;;  %v735_v5 = vadd.f32 %v727_v1, %v682_v2 }
  0xf9   : > { %v1252_v6 = vadd.f32 %v1004_v14, %v737_v3  ;;  %v1011_v51 = vmul.f32 -1.442695, %v1248_v4 }
  0xfa   : > { %v1009_v7 = vmul.f32 -1.442695, %v1250_v56  ;;  %v1256_v8 = vadd.f32 %v1004_v14, %v735_v5 }
  0xfb   : > { %v1012_v9 = vmul.f32 -1.442695, %v1252_v6  ;;  %1094 = vpow2.f32 %v1011_v51 }
  0xfc   : > { %1096 = vpow2.f32 %v1009_v7  ;;  %v1010_v59 = vmul.f32 -1.442695, %v1256_v8 }
  0xfd   : > { %v1087_v10 = vpop.eup %1086  ;;  %1098 = vpow2.f32 %v1012_v9 }
  0xfe   : > { %v1089_v11 = vpop.eup %1088  ;;  %v779_v12 = vadd.f32 1.0, %v1087_v10  ;;  %1100 = vpow2.f32 %v1010_v59 }
  0xff   : > { %v1091_v13 = vpop.eup %1090  ;;  %v777_v16 = vadd.f32 1.0, %v1089_v11 }
 0x100   : > { %v1093_v15 = vpop.eup %1092  ;;  %1102 = vrcp.f32 %v779_v12  ;;  %v780_v17 = vadd.f32 1.0, %v1091_v13 }
 0x101   : > { %v778_v18 = vadd.f32 1.0, %v1093_v15 }
 0x102   : > { %1104 = vrcp.f32 %v780_v17 }
 0x103   : > { %1106 = vrcp.f32 %v777_v16 }
 0x104   : > { %1108 = vrcp.f32 %v778_v18 }
 0x105   : > { %v1095_v14 = vpop.eup %1094 }
 0x106   : > { %v1097_v19 = vpop.eup %1096  ;;  %v783_v23 = vadd.f32 1.0, %v1095_v14 }
 0x107   : > { %v1099_v20 = vpop.eup %1098  ;;  %v781_v21 = vadd.f32 1.0, %v1097_v19 }
 0x108   : > { %v1101_v22 = vpop.eup %1100  ;;  %v784_v26 = vadd.f32 1.0, %v1099_v20 }
 0x109   : > { %1110 = vrcp.f32 %v781_v21  ;;  %v782_v24 = vadd.f32 1.0, %v1101_v22 }
 0x10a   : > { %v1103_v25 = vpop.eup %1102 }
 0x10b   : > { %1112 = vrcp.f32 %v782_v24  ;;  %813 = vrot.lane.b32.xlu0 %v1103_v25, %s1129_s8 }
 0x10c   : > { %v1105_v27 = vpop.eup %1104  ;;  %1114 = vrcp.f32 %v783_v23 }
 0x10d   : > { %815 = vrot.lane.b32.xlu1 %v1105_v27, %s1129_s8  ;;  %v1107_v28 = vpop.eup %1106  ;;  %1116 = vrcp.f32 %v784_v26 }
 0x10e   : > { %v1109_v29 = vpop.eup %1108 }
 0x10f   : > { %809 = vrot.lane.b32.xlu0 %v1107_v28, %s1129_s8 }
 0x111   : > { %811 = vrot.lane.b32.xlu1 %v1109_v29, %s1129_s8 }
 0x113   : > { %v1111_v31 = vpop.eup %1110 }
 0x114   : > { %817 = vrot.lane.b32.xlu0 %v1111_v31, %s1129_s8 }
 0x115   : > { %v1113_v32 = vpop.eup %1112 }
 0x116   : > { %819 = vrot.lane.b32.xlu1 %v1113_v32, %s1129_s8  ;;  %v1115_v33 = vpop.eup %1114 }
 0x117   : > { %v1117_v34 = vpop.eup %1116 }
 0x118   : > { %821 = vrot.lane.b32.xlu0 %v1115_v33, %s1129_s8 }
 0x11a   : > { %823 = vrot.lane.b32.xlu1 %v1117_v34, %s1129_s8 }
 0x17d   : > { %v814_v36 = vpop.permute.xlu0 %813 }
 0x17e   : > { %v835_v39 = vmul.f32 %v814_v36, %v1231_v30 }
 0x17f   : > { %v816_v40 = vpop.permute.xlu1 %815 }
 0x180   : > { %v836_v41 = vmul.f32 %v816_v40, %v1238_v44  ;;  %853 = vrot.lane.b32.xlu0 %v835_v39, %s1130_s9 }
 0x181   : > { %v810_v35 = vpop.permute.xlu0 %809 }
 0x182   : > { %v833_v38 = vmul.f32 %v810_v35, %v1234_v37  ;;  %855 = vrot.lane.b32.xlu1 %v836_v41, %s1130_s9 }
 0x183   : > { %v812_v43 = vpop.permute.xlu1 %811 }
 0x184   : > { %v834_v45 = vmul.f32 %v812_v43, %v1241_v49  ;;  %849 = vrot.lane.b32.xlu0 %v833_v38, %s1130_s9 }
 0x186   : > { %851 = vrot.lane.b32.xlu1 %v834_v45, %s1130_s9  ;;  %v818_v46 = vpop.permute.xlu0 %817 }
 0x187   : > { %v837_v47 = vmul.f32 %v818_v46, %v1250_v56 }
 0x188   : > { %v820_v48 = vpop.permute.xlu1 %819 }
 0x189   : > { %v838_v30 = vmul.f32 %v820_v48, %v1256_v8  ;;  %857 = vrot.lane.b32.xlu0 %v837_v47, %s1130_s9 }
 0x18a   : > { %v822_v44 = vpop.permute.xlu0 %821 }
 0x18b   : > { %v839_v42 = vmul.f32 %v822_v44, %v1248_v4  ;;  %859 = vrot.lane.b32.xlu1 %v838_v30, %s1130_s9 }
 0x18c   : > { %v824_v50 = vpop.permute.xlu1 %823 }
 0x18d   : > { %v840_v37 = vmul.f32 %v824_v50, %v1252_v6  ;;  %861 = vrot.lane.b32.xlu0 %v839_v42, %s1130_s9 }
 0x18f   : > { %863 = vrot.lane.b32.xlu1 %v840_v37, %s1130_s9 }
 0x1f2   : > { %v854_v49 = vpop.permute.xlu0 %853 }
 0x1f3   : > { %v875_v52 = vadd.f32 %v854_v49, %v835_v39 }
 0x1f4   : > { %v856_v53 = vpop.permute.xlu1 %855 }
 0x1f5   : > { %883 = vst.msk [vmem:[%s324_s12 + $0x10] sm:$0xff] %vm485_vm1, %v875_v52  ;;  %v876_v54 = vadd.f32 %v856_v53, %v836_v41 }
 0x1f6   : > { %v850_v55 = vpop.permute.xlu0 %849 }
 0x1f7   : > { %884 = vst.msk [vmem:[%s324_s12 + $0x18] sm:$0xff] %vm485_vm1, %v876_v54  ;;  %v873_v60 = vadd.f32 %v850_v55, %v833_v38 }
 0x1f8   : > { %v852_v61 = vpop.permute.xlu1 %851 }
 0x1f9   : > { %881 = vst.msk [vmem:[%s324_s12] sm:$0xff] %vm485_vm1, %v873_v60  ;;  %v874_v58 = vadd.f32 %v852_v61, %v834_v45 }
 0x1fb   : > { %882 = vst.msk [vmem:[%s324_s12 + $0x8] sm:$0xff] %vm485_vm1, %v874_v58  ;;  %v858_v62 = vpop.permute.xlu0 %857 }
 0x1fc   : > { %v877_v63 = vadd.f32 %v858_v62, %v837_v47 }
 0x1fd   : > { %v860_v0 = vpop.permute.xlu1 %859 }
 0x1fe   : > { %885 = vst.msk [vmem:[%s324_s12 + $0x20] sm:$0xff] %vm485_vm1, %v877_v63  ;;  %v878_v1 = vadd.f32 %v860_v0, %v838_v30 }
 0x1ff   : > { %v862_v57 = vpop.permute.xlu0 %861 }
 0x200   : > { %886 = vst.msk [vmem:[%s324_s12 + $0x28] sm:$0xff] %vm485_vm1, %v878_v1  ;;  %v879_v2 = vadd.f32 %v862_v57, %v839_v42 }
 0x201   : > { %v864_v3 = vpop.permute.xlu1 %863 }
 0x202   : > { %887 = vst.msk [vmem:[%s324_s12 + $0x30] sm:$0xff] %vm485_vm1, %v879_v2  ;;  %v880_v4 = vadd.f32 %v864_v3, %v840_v37 }
 0x204   : > { %888 = vst.msk [vmem:[%s324_s12 + $0x38] sm:$0xff] %vm485_vm1, %v880_v4 }
 0x205 PF: > { %s17_s24 = sadd.s32 1, %s1124_s24  }
 0x206   : > { %p14_p4 = scmp.ge.s32.totalorder %s17_s24, 5  }
 0x208   :  { %16 = sbr.rel (!%p14_p4) target bundleno = 1 (0x1), region = 84 }

</bundles_post_ra>
